<compile_context>
chip_gen: v7x
topology: tpu7x:2x2x1
jax: 0.10.0
libtpu: 0.0.40
codegen_flags: <defaults>
</compile_context>

<pallas_src>
import jax
import jax.numpy as jnp
from jax.experimental import pallas as pl
from jax.experimental.pallas import tpu as pltpu

_LANE = 128


def _scale_kernel(scale_ref, x_ref, o_ref):
    # scale_ref: (1, 1) f32 scalar in SMEM; x_ref / o_ref: (TR, 128) VMEM tiles.
    # Compute in f32 (PyTorch promotes fp32 Parameter * input), cast on store.
    s = scale_ref[0, 0]
    o_ref[...] = (x_ref[...].astype(jnp.float32) * s).astype(o_ref.dtype)


def _vmem_capacity_bytes() -> int:
    # Generation-aware block sizing (v7x has 64 MiB VMEM vs 128 MiB on v5e/v6e).
    try:
        return int(pltpu.get_tpu_info().vmem_capacity_bytes)
    except Exception:
        return 64 << 20  # conservative fallback


def scale_layer(x: jax.Array, scale: jax.Array, *,
                min_pallas_bytes: int = 256 * 1024,
                donate_x: bool = False) -> jax.Array:
    """Pallas equivalent of ScaleLayer.forward: returns x * scale.

    x:     any-shaped float array (e.g. NCHW feature map).
    scale: shape (1,) float parameter (like nn.Parameter(FloatTensor([v]))).
    """
    orig_shape = x.shape
    n = x.size
    in_dtype = x.dtype
    out_dtype = jnp.result_type(in_dtype, scale.dtype)   # PyTorch-style promotion
    in_item = jnp.dtype(in_dtype).itemsize
    out_item = jnp.dtype(out_dtype).itemsize

    # XLA fast paths (already at one-read + one-write roofline):
    #  - tiny tensors: launch / pipeline prologue would dominate,
    #  - ragged flat sizes: avoids pad + slice full-array round trips (~3x traffic).
    if n == 0 or n * in_item < min_pallas_bytes or n % _LANE != 0:
        return (x * scale.reshape(())).astype(out_dtype)

    rows = n // _LANE
    # Sublane packing: row-tiles must tile both the input and output dtypes.
    sub = max(8, 32 // in_item, 32 // out_item)
    if rows < 2 * sub:
        return (x * scale.reshape(())).astype(out_dtype)

    # ~8 MiB of combined (in + out) traffic per grid step; 4 pipeline buffers
    # (in + out, double-buffered) must fit in VMEM with ample headroom.
    combined_item = in_item + out_item
    step_bytes = min(8 << 20, _vmem_capacity_bytes() // 8)
    target_rows = max(sub, (step_bytes // (_LANE * combined_item)) // sub * sub)

    rows_ceil = -(-rows // sub) * sub
    tr = min(target_rows, rows_ceil)
    # Prefer >= 2 grid steps so read/write DMA overlap and v7x's two
    # TensorCores both get row blocks.
    half_rows = -(-((rows + 1) // 2) // sub) * sub
    tr = min(tr, max(sub, half_rows))

    grid = (pl.cdiv(rows, tr),)
    x_2d = x.reshape(rows, _LANE)                       # zero-copy view
    scale_2d = scale.astype(jnp.float32).reshape(1, 1)  # SMEM scalar

    extra = {}
    if donate_x and in_dtype == out_dtype:
        # x (input index 1; index 0 is the scale scalar) aliases the output.
        extra["input_output_aliases"] = {1: 0}

    out_2d = pl.pallas_call(
        _scale_kernel,
        out_shape=jax.ShapeDtypeStruct((rows, _LANE), out_dtype),
        grid=grid,
        in_specs=[
            pl.BlockSpec(memory_space=pltpu.SMEM),        # scale scalar
            pl.BlockSpec((tr, _LANE), lambda i: (i, 0)),  # x row-tile
        ],
        out_specs=pl.BlockSpec((tr, _LANE), lambda i: (i, 0)),
        compiler_params=pltpu.CompilerParams(
            dimension_semantics=("parallel",),
            # Needed buffers are <= ~20 MiB; raised above v5e's 16 MiB scoped
            # default so double-buffering is preserved, well under every
            # generation's physical VMEM (64 MiB on v7x).
            vmem_limit_bytes=32 << 20,
        ),
        cost_estimate=pl.CostEstimate(
            flops=n,
            transcendentals=0,
            bytes_accessed=n * in_item + n * out_item,
        ),
        **extra,
    )(scale_2d, x_2d)

    return out_2d.reshape(orig_shape)


if __name__ == "__main__":
    key = jax.random.PRNGKey(0)
    k1, k2, k3 = jax.random.split(key, 3)

    # ScaleLayer(init_value=1) -> scale parameter [1.0] (module default).
    scale = jnp.array([1.0], dtype=jnp.float32)

    # NCHW feature map large enough to exercise the Pallas path.
    x = jax.random.normal(k1, (2, 4, 128, 128), dtype=jnp.float32)
    out = jax.block_until_ready(scale_layer(x, scale))
    ref = x * scale
    assert out.shape == x.shape and out.dtype == ref.dtype
    assert jnp.allclose(out, ref, atol=1e-6, rtol=1e-6)

    # Non-trivial scale through the Pallas path.
    scale_b = jnp.array([0.73], dtype=jnp.float32)
    out_b = jax.block_until_ready(scale_layer(x, scale_b))
    assert jnp.allclose(out_b, x * scale_b, atol=1e-6, rtol=1e-6)

    # Tiny tensor -> XLA fast path (kernel launch overhead would dominate).
    x_small = jax.random.normal(k2, (2, 4, 16, 16), dtype=jnp.float32)
    out_small = jax.block_until_ready(scale_layer(x_small, scale_b))
    assert jnp.allclose(out_small, x_small * scale_b, atol=1e-6, rtol=1e-6)

    # Ragged flat size (not a multiple of 128) -> fused XLA fallback
    # (no pad/slice round trips).
    x_rag = jax.random.normal(k3, (3, 5, 77, 111), dtype=jnp.float32)
    out_rag = jax.block_until_ready(scale_layer(x_rag, scale_b))
    assert jnp.allclose(out_rag, x_rag * scale_b, atol=1e-6, rtol=1e-6)

    print("KERNEL_OK")
</pallas_src>

<mosaic_0001>
module attributes {stable_mosaic.version = 11 : i64} {
  func.func @_scale_kernel(%arg0: i32, %arg1: memref<1x1xf32, #tpu.memory_space<smem>>, %arg2: memref<512x128xf32, #tpu.memory_space<vmem>>, %arg3: memref<512x128xf32, #tpu.memory_space<vmem>>) attributes {dimension_semantics = [#tpu.dimension_semantics<parallel>], iteration_bounds = array<i64: 2>, scalar_prefetch = 0 : i64, scratch_operands = 0 : i64, tpu.core_type = #tpu.core_type<tc>, window_params = [{transform_indices = @transform_0, window_bounds = array<i64: 1, 1>}, {transform_indices = @transform_1, window_bounds = array<i64: 512, 128>}, {transform_indices = @transform_2, window_bounds = array<i64: 512, 128>}]} {
    %c0 = arith.constant 0 : index
    %c0_0 = arith.constant 0 : index
    %0 = memref.load %arg1[%c0, %c0_0] : memref<1x1xf32, #tpu.memory_space<smem>>
    %c0_1 = arith.constant 0 : index
    %c0_2 = arith.constant 0 : index
    %1 = vector.load %arg2[%c0_1, %c0_2] : memref<512x128xf32, #tpu.memory_space<vmem>>, vector<512x128xf32>
    %2 = vector.broadcast %0 : f32 to vector<512x128xf32>
    %3 = arith.mulf %1, %2 : vector<512x128xf32>
    %c0_3 = arith.constant 0 : index
    %c0_4 = arith.constant 0 : index
    %4 = vector.load %arg3[%c0_3, %c0_4] : memref<512x128xf32, #tpu.memory_space<vmem>>, vector<512x128xf32>
    tpu.vector_store %arg3[%c0_3, %c0_4], %3 {strides = array<i32>} : memref<512x128xf32, #tpu.memory_space<vmem>>, vector<512x128xf32>,
    return
  }
  func.func @transform_0(%arg0: i32) -> (i32, i32) {
    %c0_i32 = arith.constant 0 : i32
    %c0_i32_0 = arith.constant 0 : i32
    %c0_i32_1 = arith.constant 0 : i32
    return %c0_i32, %c0_i32_0 : i32, i32
  }
  func.func @transform_1(%arg0: i32) -> (i32, i32) {
    %c0_i32 = arith.constant 0 : i32
    %c0_i32_0 = arith.constant 0 : i32
    return %arg0, %c0_i32 : i32, i32
  }
  func.func @transform_2(%arg0: i32) -> (i32, i32) {
    %c0_i32 = arith.constant 0 : i32
    %c0_i32_0 = arith.constant 0 : i32
    return %arg0, %c0_i32 : i32, i32
  }
}

</mosaic_0001>

<bundles_post_ra>
// kernel: tpu_custom_call.1
= control target key start
LH: loop header
LB: loop body
LE: loop exit
PB: predicated region body
PF: predicated region fallthrough
CT: control target
= control target key end

     0   :  { %s995_s0 = inlined_call_operand.<no memory space> [shape: f32[1,1], index: 0, kind: input, shape index: {}]   ;;  %s996_s1 = inlined_call_operand.hbm [shape: f32[1024,128], index: 1, kind: input, shape index: {}]   ;;  %s997_s2 = inlined_call_operand.hbm [shape: f32[1024,128], index: 2, kind: output, shape index: {}]  }
   0x1   :  { %7 = sst [smem:[#allocation2]] %s995_s0 }
   0x2   :  { %8 = vsyncpa [#allocation4], 0 }
   0x3   :  { %10 = vsyncpa [#allocation4 + $0x1], 0 }
   0x4   :  { %11 = vsyncpa [#allocation5], 0 }
   0x5   :  { %13 = vsyncpa [#allocation5 + $0x1], 0  ;;  %s634_s11 = smov 0   ;;  %s636_s12 = smov 0  }
   0x6   :  { %s638_s13 = smov 0   ;;  %s640_s14 = smov 0  }
   0x7 LB: > { %s655_s0 = sadd.s32 4294967295, %s608_s14   ;;  %s446_s15 = sadd.s32 4294967294, %s608_s14   ;;  %s608_s14 = sphi %s640_s14, %s1010_s14   ;;  %s604_s13 = sphi %s638_s13, %s1009_s13   ;;  %s600_s12 = sphi %s636_s12, %s1008_s12   ;;  %s596_s11 = sphi %s634_s11, %s1007_s11  }
   0x8   : > { %s659_s16 = sadd.s32 1, %s608_s14   ;;  %s47_s17 = sadd.s32 1, %s604_s13 }
   0x9   : > { %s44_s18 = ssub.s32 %s608_s14, %s659_s16  ;;  %p54_p0 = scmp.ne.s32.totalorder %s604_s13, %s600_s12 }
   0xa   : > { %p45_p1 = scmp.eq.s32.totalorder %s44_s18, 0  ;;  %p55_p2 = scmp.eq.s32.totalorder %s608_s14, 0 }
   0xb   : > { %p60_p3 = scmp.ne.s32.totalorder %s600_s12, %s596_s11  ;;  %p61_p4 = scmp.eq.s32.totalorder %s655_s0, 0 }
   0xc   : > { %s671_s19 = scalar_select %p45_p1, %s604_s13, %s47_s17  }
   0xd   : > { %p673_p5 = por %p55_p2, %p54_p0  ;;  %p677_p6 = por %p61_p4, %p60_p3 }
   0xe   : > { %p84_p7 = scmp.eq.s32.totalorder %s655_s0, 1  ;;  %p90_p8 = scmp.eq.s32.totalorder %s446_s15, 1 }
   0xf   : > { %p474_p10 = scmp.lt.s32.totalorder %s608_s14, 2  ;;  %s113_s24 = sand.u32 1, %s604_s13  }
  0x10   : > { %p684_p11 = por %p84_p7, %p54_p0  ;;  %p688_p12 = por %p90_p8, %p60_p3 }
  0x11   : > { %s460_s25 = sshll.u32 %s608_s14, 13  ;;  %s449_s26 = sshll.u32 %s113_s24, 9 }
  0x12   : > { %s1001_s22 = scalar_select %p684_p11, 1, 0 }
  0x13   : > { %s1002_s23 = scalar_select %p688_p12, 1, 0 }
  0x14   : > { %s697_s29 = scalar_lea.hbm %s996_s1, %s460_s25  ;;  %s117_s30 = scalar_lea.vmem [#allocation3], %s449_s26 }
  0x15   : > { %s124_s3 = sshll.u32 %s117_s30, 4  ;;  %p701_p13 = pnand %p474_p10, %p673_p5  ;;  %s705_s3 = int_to_ptr.vmem [resolvable:$true] %s124_s3 }
  0x16   : > { %s707_s5 = scalar_lea.sflag [#allocation4], %s113_s24  ;;  %s512_s6 = scalar_lea.hbm %s697_s29, 8192 }
  0x17   : > { %p513_p0 = scmp.ne.s32.totalorder %s697_s29, %s512_s6  ;;  %p514_p1 = pneg %p701_p13 }
  0x18   : > { %s517_s9 = scalar_lea.hbm %s996_s1, 16384  ;;  %p518_p4 = scmp.lt.u32.totalorder %s697_s29, %s996_s1 }
  0x19   : > { %p515_p2 = pnand %p514_p1, %p513_p0  ;;  %p519_p5 = scmp.lt.u32.totalorder %s517_s9, %s512_s6 }
  0x1a   : > { %p521_p8 = scmp.lt.u32.totalorder %s512_s6, %s697_s29 }
  0x1b   : > { %p516_p3 = pneg %p515_p2  ;;  %p520_p7 = por %p519_p5, %p518_p4 }
  0x1d   : > { %p522_p10 = por %p521_p8, %p520_p7 }
  0x1f   : > { %p523_p9 = pnand %p522_p10, %p516_p3 }
  0x21   : > { %526 = shalt.err (!%p523_p9)
}
  0x22   : > { %s527_s17 = scalar_lea.vmem %s705_s3, 8192  ;;  %s610_s18 = smov [#allocation3]  }
  0x23   : > { %p528_p0 = scmp.ne.s32.totalorder %s705_s3, %s527_s17  ;;  %s532_s20 = sshll.u32 %s610_s18, 4  ;;  %s533_s20 = int_to_ptr.vmem [resolvable:$false] %s532_s20 }
  0x24   : > { %s534_s24 = scalar_lea.vmem %s533_s20, 16384  ;;  %p535_p11 = scmp.lt.s32.totalorder %s705_s3, %s533_s20 }
  0x25   : > { %p530_p2 = pnand %p528_p0, %p514_p1  ;;  %p536_p4 = scmp.lt.s32.totalorder %s534_s24, %s527_s17 }
  0x27   : > { %p531_p12 = pneg %p530_p2  ;;  %p537_p5 = por %p536_p4, %p535_p11 }
  0x29   : > { %p538_p7 = pnand %p537_p5, %p531_p12 }
  0x2b   : > { %541 = shalt.err (!%p538_p7)
}
  0x2c   : > { %s611_s25 = smov 128   ;;  %s612_s26 = smov 8  }
  0x2d   : > { %469 = dma.hbm_to_vmem [thread:$0]  (!%p701_p13), %s697_s29, 8192, %s705_s3, %s707_s5, %s611_s25, %s611_s25, %s612_s26  }
  0x2e   : > { %p452_p9 = scmp.ge.s32.totalorder %s608_s14, 1  ;;  %p132_p1 = scmp.lt.s32.totalorder %s608_s14, 3 }
  0x30   : > { %p133_p3 = pnand %p452_p9, %p132_p1 }
  0x31   : > { %s738_s27 = sand.u32 (!%p133_p3), 1, %s600_s12  }
  0x32   : > { %136 = sbr.rel (%p133_p3) target bundleno = 113 (0x71), region = 28  ;;  %s453_s28 = sshll.u32 (!%p133_p3), %s738_s27, 9 }
  0x33   : > { %s139_s30 = scalar_lea.sflag (!%p133_p3), [#allocation4], %s738_s27  ;;  %s742_s6 = scalar_lea.vmem (!%p133_p3), [#allocation3], %s453_s28 }
  0x39   : > { %587 = dma.done.wait (%p677_p6), %s139_s30, 8192  }
  0x3a   : > { %589 = vsyncadd (%p677_p6), %s139_s30, 4294959104  ;;  %s165_s29 = sld [smem:[#allocation2]]  ;;  %v166_v0 = vld [vmem:[%s742_s6] sm:$0xff]  ;;  %v167_v2 = vld [vmem:[%s742_s6 + $0x8] sm:$0xff]  ;;  %s765_s21 = scalar_lea.vmem [#allocation6], %s453_s28 }
  0x3b   : > { %v168_v3 = vld [vmem:[%s742_s6 + $0x10] sm:$0xff]  ;;  %v169_v7 = vld [vmem:[%s742_s6 + $0x18] sm:$0xff]  ;;  %v170_v8 = vld [vmem:[%s742_s6 + $0x20] sm:$0xff]  ;;  %s461_s3 = sshll.u32 %s655_s0, 13  ;;  %s373_s4 = sshll.u32 %s765_s21, 4  ;;  %s943_s4 = int_to_ptr.vmem [resolvable:$true] %s373_s4 }
  0x3c   : > { %v171_v9 = vld [vmem:[%s742_s6 + $0x28] sm:$0xff]  ;;  %v172_v13 = vld [vmem:[%s742_s6 + $0x30] sm:$0xff]  ;;  %v173_v14 = vld [vmem:[%s742_s6 + $0x38] sm:$0xff]  ;;  %s941_s7 = scalar_lea.hbm %s997_s2, %s461_s3  ;;  %s360_s8 = scalar_lea.sflag [#allocation5], %s738_s27 }
  0x3d   : > { %v174_v15 = vld [vmem:[%s742_s6 + $0x40] sm:$0xff]  ;;  %v175_v19 = vld [vmem:[%s742_s6 + $0x48] sm:$0xff]  ;;  %v176_v20 = vld [vmem:[%s742_s6 + $0x50] sm:$0xff]  ;;  %s542_s9 = scalar_lea.vmem %s943_s4, 8192  ;;  %p1004_p11 = scmp.ne.s32.totalorder %s1001_s22, 0 }
  0x3e   : > { %v177_v21 = vld [vmem:[%s742_s6 + $0x58] sm:$0xff]  ;;  %v178_v25 = vld [vmem:[%s742_s6 + $0x60] sm:$0xff]  ;;  %v179_v26 = vld [vmem:[%s742_s6 + $0x68] sm:$0xff]  ;;  %p543_p6 = scmp.ne.s32.totalorder %s943_s4, %s542_s9  ;;  %s613_s10 = smov [#allocation6]  }
  0x3f   : > { %v180_v27 = vld [vmem:[%s742_s6 + $0x70] sm:$0xff]  ;;  %v181_v31 = vld [vmem:[%s742_s6 + $0x78] sm:$0xff]  ;;  %v182_v32 = vld [vmem:[%s742_s6 + $0x80] sm:$0xff]  ;;  %s546_s15 = sshll.u32 %s613_s10, 4  ;;  %s547_s15 = int_to_ptr.vmem [resolvable:$false] %s546_s15 }
  0x40   : > { %v749_v1 = vstv %s165_s29  ;;  %v183_v33 = vld [vmem:[%s742_s6 + $0x88] sm:$0xff]  ;;  %v184_v37 = vld [vmem:[%s742_s6 + $0x90] sm:$0xff]  ;;  %v185_v38 = vld [vmem:[%s742_s6 + $0x98] sm:$0xff]  ;;  %p544_p12 = pnand %p543_p6, %p1004_p11  ;;  %s548_s17 = scalar_lea.vmem %s547_s15, 16384 }
  0x41   : > { %v231_v4 = vmul.f32 %v749_v1, %v166_v0  ;;  %v232_v5 = vmul.f32 %v749_v1, %v167_v2  ;;  %v233_v6 = vmul.f32 %v749_v1, %v168_v3  ;;  %v234_v10 = vmul.f32 %v749_v1, %v169_v7  ;;  %v186_v39 = vld [vmem:[%s742_s6 + $0xa0] sm:$0xff]  ;;  %v187_v43 = vld [vmem:[%s742_s6 + $0xa8] sm:$0xff]  ;;  %v188_v44 = vld [vmem:[%s742_s6 + $0xb0] sm:$0xff]  ;;  %p549_p8 = scmp.lt.s32.totalorder %s943_s4, %s547_s15  ;;  %p550_p10 = scmp.lt.s32.totalorder %s548_s17, %s542_s9 }
  0x42   : > { %v235_v11 = vmul.f32 %v749_v1, %v170_v8  ;;  %v236_v12 = vmul.f32 %v749_v1, %v171_v9  ;;  %v237_v16 = vmul.f32 %v749_v1, %v172_v13  ;;  %v238_v17 = vmul.f32 %v749_v1, %v173_v14  ;;  %v189_v45 = vld [vmem:[%s742_s6 + $0xb8] sm:$0xff]  ;;  %v190_v49 = vld [vmem:[%s742_s6 + $0xc0] sm:$0xff]  ;;  %v191_v50 = vld [vmem:[%s742_s6 + $0xc8] sm:$0xff]  ;;  %p545_p13 = pneg %p544_p12 }
  0x43   : > { %295 = vst [vmem:[%s765_s21] sm:$0xff] %v231_v4  ;;  %296 = vst [vmem:[%s765_s21 + $0x8] sm:$0xff] %v232_v5  ;;  %v239_v18 = vmul.f32 %v749_v1, %v174_v15  ;;  %v240_v22 = vmul.f32 %v749_v1, %v175_v19  ;;  %v241_v23 = vmul.f32 %v749_v1, %v176_v20  ;;  %v192_v51 = vld [vmem:[%s742_s6 + $0xd0] sm:$0xff]  ;;  %v193_v55 = vld [vmem:[%s742_s6 + $0xd8] sm:$0xff]  ;;  %p551_p0 = por %p550_p10, %p549_p8 }
  0x44   : > { %297 = vst [vmem:[%s765_s21 + $0x10] sm:$0xff] %v233_v6  ;;  %298 = vst [vmem:[%s765_s21 + $0x18] sm:$0xff] %v234_v10  ;;  %v242_v24 = vmul.f32 %v749_v1, %v177_v21  ;;  %v243_v28 = vmul.f32 %v749_v1, %v178_v25  ;;  %v244_v29 = vmul.f32 %v749_v1, %v179_v26  ;;  %v194_v56 = vld [vmem:[%s742_s6 + $0xe0] sm:$0xff]  ;;  %v195_v57 = vld [vmem:[%s742_s6 + $0xe8] sm:$0xff] }
  0x45   : > { %299 = vst [vmem:[%s765_s21 + $0x20] sm:$0xff] %v235_v11  ;;  %300 = vst [vmem:[%s765_s21 + $0x28] sm:$0xff] %v236_v12  ;;  %v245_v30 = vmul.f32 %v749_v1, %v180_v27  ;;  %v246_v34 = vmul.f32 %v749_v1, %v181_v31  ;;  %v247_v35 = vmul.f32 %v749_v1, %v182_v32  ;;  %v196_v61 = vld [vmem:[%s742_s6 + $0xf0] sm:$0xff]  ;;  %v197_v62 = vld [vmem:[%s742_s6 + $0xf8] sm:$0xff]  ;;  %p552_p2 = pnand %p551_p0, %p545_p13 }
  0x46   : > { %301 = vst [vmem:[%s765_s21 + $0x30] sm:$0xff] %v237_v16  ;;  %302 = vst [vmem:[%s765_s21 + $0x38] sm:$0xff] %v238_v17  ;;  %v248_v36 = vmul.f32 %v749_v1, %v183_v33  ;;  %v249_v40 = vmul.f32 %v749_v1, %v184_v37  ;;  %v250_v41 = vmul.f32 %v749_v1, %v185_v38  ;;  %v198_v63 = vld [vmem:[%s742_s6 + $0x100] sm:$0xff]  ;;  %v199_v4 = vld [vmem:[%s742_s6 + $0x108] sm:$0xff] }
  0x47   : > { %303 = vst [vmem:[%s765_s21 + $0x40] sm:$0xff] %v239_v18  ;;  %304 = vst [vmem:[%s765_s21 + $0x48] sm:$0xff] %v240_v22  ;;  %v251_v42 = vmul.f32 %v749_v1, %v186_v39  ;;  %v252_v46 = vmul.f32 %v749_v1, %v187_v43  ;;  %v253_v47 = vmul.f32 %v749_v1, %v188_v44  ;;  %v200_v5 = vld [vmem:[%s742_s6 + $0x110] sm:$0xff]  ;;  %v201_v6 = vld [vmem:[%s742_s6 + $0x118] sm:$0xff] }
  0x48   : > { %305 = vst [vmem:[%s765_s21 + $0x50] sm:$0xff] %v241_v23  ;;  %306 = vst [vmem:[%s765_s21 + $0x58] sm:$0xff] %v242_v24  ;;  %v254_v48 = vmul.f32 %v749_v1, %v189_v45  ;;  %v255_v52 = vmul.f32 %v749_v1, %v190_v49  ;;  %v256_v53 = vmul.f32 %v749_v1, %v191_v50  ;;  %v202_v10 = vld [vmem:[%s742_s6 + $0x120] sm:$0xff]  ;;  %v203_v11 = vld [vmem:[%s742_s6 + $0x128] sm:$0xff] }
  0x49   : > { %307 = vst [vmem:[%s765_s21 + $0x60] sm:$0xff] %v243_v28  ;;  %308 = vst [vmem:[%s765_s21 + $0x68] sm:$0xff] %v244_v29  ;;  %v257_v54 = vmul.f32 %v749_v1, %v192_v51  ;;  %v258_v58 = vmul.f32 %v749_v1, %v193_v55  ;;  %v259_v59 = vmul.f32 %v749_v1, %v194_v56  ;;  %v204_v12 = vld [vmem:[%s742_s6 + $0x130] sm:$0xff]  ;;  %v205_v16 = vld [vmem:[%s742_s6 + $0x138] sm:$0xff] }
  0x4a   : > { %309 = vst [vmem:[%s765_s21 + $0x70] sm:$0xff] %v245_v30  ;;  %310 = vst [vmem:[%s765_s21 + $0x78] sm:$0xff] %v246_v34  ;;  %v260_v60 = vmul.f32 %v749_v1, %v195_v57  ;;  %v261_v0 = vmul.f32 %v749_v1, %v196_v61  ;;  %v262_v2 = vmul.f32 %v749_v1, %v197_v62  ;;  %v206_v17 = vld [vmem:[%s742_s6 + $0x140] sm:$0xff]  ;;  %v207_v18 = vld [vmem:[%s742_s6 + $0x148] sm:$0xff] }
  0x4b   : > { %311 = vst [vmem:[%s765_s21 + $0x80] sm:$0xff] %v247_v35  ;;  %312 = vst [vmem:[%s765_s21 + $0x88] sm:$0xff] %v248_v36  ;;  %v263_v3 = vmul.f32 %v749_v1, %v198_v63  ;;  %v264_v7 = vmul.f32 %v749_v1, %v199_v4  ;;  %v265_v8 = vmul.f32 %v749_v1, %v200_v5  ;;  %v208_v22 = vld [vmem:[%s742_s6 + $0x150] sm:$0xff]  ;;  %v209_v23 = vld [vmem:[%s742_s6 + $0x158] sm:$0xff] }
  0x4c   : > { %313 = vst [vmem:[%s765_s21 + $0x90] sm:$0xff] %v249_v40  ;;  %314 = vst [vmem:[%s765_s21 + $0x98] sm:$0xff] %v250_v41  ;;  %v266_v9 = vmul.f32 %v749_v1, %v201_v6  ;;  %v267_v13 = vmul.f32 %v749_v1, %v202_v10  ;;  %v268_v14 = vmul.f32 %v749_v1, %v203_v11  ;;  %v210_v24 = vld [vmem:[%s742_s6 + $0x160] sm:$0xff]  ;;  %v211_v28 = vld [vmem:[%s742_s6 + $0x168] sm:$0xff] }
  0x4d   : > { %315 = vst [vmem:[%s765_s21 + $0xa0] sm:$0xff] %v251_v42  ;;  %316 = vst [vmem:[%s765_s21 + $0xa8] sm:$0xff] %v252_v46  ;;  %v269_v15 = vmul.f32 %v749_v1, %v204_v12  ;;  %v270_v19 = vmul.f32 %v749_v1, %v205_v16  ;;  %v271_v20 = vmul.f32 %v749_v1, %v206_v17  ;;  %v212_v29 = vld [vmem:[%s742_s6 + $0x170] sm:$0xff]  ;;  %v213_v30 = vld [vmem:[%s742_s6 + $0x178] sm:$0xff] }
  0x4e   : > { %317 = vst [vmem:[%s765_s21 + $0xb0] sm:$0xff] %v253_v47  ;;  %318 = vst [vmem:[%s765_s21 + $0xb8] sm:$0xff] %v254_v48  ;;  %v272_v21 = vmul.f32 %v749_v1, %v207_v18  ;;  %v273_v25 = vmul.f32 %v749_v1, %v208_v22  ;;  %v274_v26 = vmul.f32 %v749_v1, %v209_v23  ;;  %v214_v34 = vld [vmem:[%s742_s6 + $0x180] sm:$0xff]  ;;  %v215_v35 = vld [vmem:[%s742_s6 + $0x188] sm:$0xff] }
  0x4f   : > { %319 = vst [vmem:[%s765_s21 + $0xc0] sm:$0xff] %v255_v52  ;;  %320 = vst [vmem:[%s765_s21 + $0xc8] sm:$0xff] %v256_v53  ;;  %v275_v27 = vmul.f32 %v749_v1, %v210_v24  ;;  %v276_v31 = vmul.f32 %v749_v1, %v211_v28  ;;  %v277_v32 = vmul.f32 %v749_v1, %v212_v29  ;;  %v216_v36 = vld [vmem:[%s742_s6 + $0x190] sm:$0xff]  ;;  %v217_v40 = vld [vmem:[%s742_s6 + $0x198] sm:$0xff] }
  0x50   : > { %321 = vst [vmem:[%s765_s21 + $0xd0] sm:$0xff] %v257_v54  ;;  %322 = vst [vmem:[%s765_s21 + $0xd8] sm:$0xff] %v258_v58  ;;  %v278_v33 = vmul.f32 %v749_v1, %v213_v30  ;;  %v279_v37 = vmul.f32 %v749_v1, %v214_v34  ;;  %v280_v38 = vmul.f32 %v749_v1, %v215_v35  ;;  %v218_v41 = vld [vmem:[%s742_s6 + $0x1a0] sm:$0xff]  ;;  %v219_v42 = vld [vmem:[%s742_s6 + $0x1a8] sm:$0xff] }
  0x51   : > { %323 = vst [vmem:[%s765_s21 + $0xe0] sm:$0xff] %v259_v59  ;;  %324 = vst [vmem:[%s765_s21 + $0xe8] sm:$0xff] %v260_v60  ;;  %v281_v39 = vmul.f32 %v749_v1, %v216_v36  ;;  %v282_v43 = vmul.f32 %v749_v1, %v217_v40  ;;  %v283_v44 = vmul.f32 %v749_v1, %v218_v41  ;;  %v220_v46 = vld [vmem:[%s742_s6 + $0x1b0] sm:$0xff]  ;;  %v221_v47 = vld [vmem:[%s742_s6 + $0x1b8] sm:$0xff] }
  0x52   : > { %325 = vst [vmem:[%s765_s21 + $0xf0] sm:$0xff] %v261_v0  ;;  %326 = vst [vmem:[%s765_s21 + $0xf8] sm:$0xff] %v262_v2  ;;  %v284_v45 = vmul.f32 %v749_v1, %v219_v42  ;;  %v222_v48 = vld [vmem:[%s742_s6 + $0x1c0] sm:$0xff]  ;;  %v285_v49 = vmul.f32 %v749_v1, %v220_v46  ;;  %v286_v50 = vmul.f32 %v749_v1, %v221_v47  ;;  %v223_v52 = vld [vmem:[%s742_s6 + $0x1c8] sm:$0xff] }
  0x53   : > { %327 = vst [vmem:[%s765_s21 + $0x100] sm:$0xff] %v263_v3  ;;  %328 = vst [vmem:[%s765_s21 + $0x108] sm:$0xff] %v264_v7  ;;  %v287_v51 = vmul.f32 %v749_v1, %v222_v48  ;;  %v224_v53 = vld [vmem:[%s742_s6 + $0x1d0] sm:$0xff]  ;;  %v225_v54 = vld [vmem:[%s742_s6 + $0x1d8] sm:$0xff]  ;;  %v288_v55 = vmul.f32 %v749_v1, %v223_v52 }
  0x54   : > { %329 = vst [vmem:[%s765_s21 + $0x110] sm:$0xff] %v265_v8  ;;  %330 = vst [vmem:[%s765_s21 + $0x118] sm:$0xff] %v266_v9  ;;  %v289_v56 = vmul.f32 %v749_v1, %v224_v53  ;;  %v290_v57 = vmul.f32 %v749_v1, %v225_v54  ;;  %v226_v58 = vld [vmem:[%s742_s6 + $0x1e0] sm:$0xff]  ;;  %v227_v59 = vld [vmem:[%s742_s6 + $0x1e8] sm:$0xff] }
  0x55   : > { %331 = vst [vmem:[%s765_s21 + $0x120] sm:$0xff] %v267_v13  ;;  %332 = vst [vmem:[%s765_s21 + $0x128] sm:$0xff] %v268_v14  ;;  %v228_v60 = vld [vmem:[%s742_s6 + $0x1f0] sm:$0xff]  ;;  %v291_v61 = vmul.f32 %v749_v1, %v226_v58  ;;  %v292_v62 = vmul.f32 %v749_v1, %v227_v59  ;;  %v229_v0 = vld [vmem:[%s742_s6 + $0x1f8] sm:$0xff] }
  0x56   : > { %333 = vst [vmem:[%s765_s21 + $0x130] sm:$0xff] %v269_v15  ;;  %334 = vst [vmem:[%s765_s21 + $0x138] sm:$0xff] %v270_v19  ;;  %v293_v63 = vmul.f32 %v749_v1, %v228_v60  ;;  %v294_v2 = vmul.f32 %v749_v1, %v229_v0 }
  0x57   : > { %335 = vst [vmem:[%s765_s21 + $0x140] sm:$0xff] %v271_v20  ;;  %336 = vst [vmem:[%s765_s21 + $0x148] sm:$0xff] %v272_v21 }
  0x58   : > { %337 = vst [vmem:[%s765_s21 + $0x150] sm:$0xff] %v273_v25  ;;  %338 = vst [vmem:[%s765_s21 + $0x158] sm:$0xff] %v274_v26 }
  0x59   : > { %339 = vst [vmem:[%s765_s21 + $0x160] sm:$0xff] %v275_v27  ;;  %340 = vst [vmem:[%s765_s21 + $0x168] sm:$0xff] %v276_v31 }
  0x5a   : > { %341 = vst [vmem:[%s765_s21 + $0x170] sm:$0xff] %v277_v32  ;;  %342 = vst [vmem:[%s765_s21 + $0x178] sm:$0xff] %v278_v33 }
  0x5b   : > { %343 = vst [vmem:[%s765_s21 + $0x180] sm:$0xff] %v279_v37  ;;  %344 = vst [vmem:[%s765_s21 + $0x188] sm:$0xff] %v280_v38 }
  0x5c   : > { %345 = vst [vmem:[%s765_s21 + $0x190] sm:$0xff] %v281_v39  ;;  %346 = vst [vmem:[%s765_s21 + $0x198] sm:$0xff] %v282_v43 }
  0x5d   : > { %347 = vst [vmem:[%s765_s21 + $0x1a0] sm:$0xff] %v283_v44  ;;  %348 = vst [vmem:[%s765_s21 + $0x1a8] sm:$0xff] %v284_v45 }
  0x5e   : > { %349 = vst [vmem:[%s765_s21 + $0x1b0] sm:$0xff] %v285_v49  ;;  %350 = vst [vmem:[%s765_s21 + $0x1b8] sm:$0xff] %v286_v50 }
  0x5f   : > { %351 = vst [vmem:[%s765_s21 + $0x1c0] sm:$0xff] %v287_v51  ;;  %352 = vst [vmem:[%s765_s21 + $0x1c8] sm:$0xff] %v288_v55 }
  0x60   : > { %353 = vst [vmem:[%s765_s21 + $0x1d0] sm:$0xff] %v289_v56  ;;  %354 = vst [vmem:[%s765_s21 + $0x1d8] sm:$0xff] %v290_v57 }
  0x61   : > { %355 = vst [vmem:[%s765_s21 + $0x1e0] sm:$0xff] %v291_v61  ;;  %356 = vst [vmem:[%s765_s21 + $0x1e8] sm:$0xff] %v292_v62 }
  0x62   : > { %357 = vst [vmem:[%s765_s21 + $0x1f0] sm:$0xff] %v293_v63  ;;  %358 = vst [vmem:[%s765_s21 + $0x1f8] sm:$0xff] %v294_v2 }
  0x63   : > { %555 = shalt.err (!%p552_p2)
}
  0x64   : > { %s556_s18 = scalar_lea.hbm %s941_s7, 8192  ;;  %s560_s25 = scalar_lea.hbm %s997_s2, 16384 }
  0x65   : > { %p557_p4 = scmp.ne.s32.totalorder %s941_s7, %s556_s18  ;;  %p561_p9 = scmp.lt.u32.totalorder %s941_s7, %s997_s2 }
  0x66   : > { %p562_p1 = scmp.lt.u32.totalorder %s560_s25, %s556_s18  ;;  %p564_p6 = scmp.lt.u32.totalorder %s556_s18, %s941_s7 }
  0x67   : > { %p558_p5 = pnand %p557_p4, %p1004_p11 }
  0x68   : > { %p563_p3 = por %p562_p1, %p561_p9 }
  0x69   : > { %p559_p7 = pneg %p558_p5 }
  0x6a   : > { %p565_p12 = por %p564_p6, %p563_p3 }
  0x6c   : > { %p566_p13 = pnand %p565_p12, %p559_p7 }
  0x6e   : > { %569 = shalt.err (!%p566_p13)
}
  0x6f   : > { %s614_s30 = smov 128   ;;  %s615_s6 = smov 8  }
  0x70   : > { %464 = dma.vmem_to_hbm [thread:$0]  (%p1004_p11), %s943_s4, 8192, %s941_s7, %s360_s8, %s614_s30, %s614_s30, %s615_s6  }
  0x71 PF: > { %s388_s29 = sand.u32 1, %s596_s11   ;;  %p1005_p8 = scmp.ne.s32.totalorder %s1002_s23, 0 }
  0x72   : > { %p1006_p10 = scmp.ge.s32.totalorder %s608_s14, 2  ;;  %s389_s21 = scalar_lea.sflag [#allocation5], %s388_s29 }
  0x74   : > { %p471_p0 = pnand %p1006_p10, %p1005_p8 }
  0x76   : > { %591 = dma.done.wait (!%p471_p0), %s389_s21, 8192  }
  0x77   : > { %593 = vsyncadd (!%p471_p0), %s389_s21, 4294959104  ;;  %p16_p2 = scmp.ge.s32.totalorder %s659_s16, 4   ;;  %s1007_s11 = smov %s600_s12 }
  0x78   : > { %s1008_s12 = smov %s604_s13  ;;  %s1009_s13 = smov %s671_s19 }
  0x79   : > { %s1010_s14 = smov %s659_s16  ;;  %18 = sbr.rel (!%p16_p2) target bundleno = 7 (0x7), region = 73 }
  0x80   :  { %394 = vsyncpa [#allocation4], 1 }
  0x81   :  { %396 = vsyncpa [#allocation4 + $0x1], 1 }
  0x82   :  { %397 = vsyncpa [#allocation5], 1 }
  0x83   :  { %399 = vsyncpa [#allocation5 + $0x1], 1 }

</bundles_post_ra>
